<compile_context>
chip_gen: v5e
topology: v5e:2x2
jax: 0.10.0
libtpu: 0.0.40
codegen_flags: <defaults>
</compile_context>

<pallas_src>
import functools

import jax
import jax.numpy as jnp
from jax.experimental import pallas as pl
from jax.experimental.pallas import tpu as pltpu

LANES = 128
SUBLANES = 8
GROUP_ELEMS = SUBLANES * LANES            # 1024 elements per (8, 128) group
TARGET_BLOCK_BYTES = 2 << 20              # ~2 MiB per input block
MIN_GRID_STEPS = 8                        # keep >= ~8 grid steps when possible


def _rmse_log_kernel(fake_ref, real_ref, out_ref, *, groups_valid,
                     groups_per_tile, num_tiles, needs_mask):
    # Upcast inside the kernel so the HBM stream stays in the native dtype.
    f = fake_ref[...].astype(jnp.float32)
    r = real_ref[...].astype(jnp.float32)
    # Two separate logs to match torch semantics exactly (log(r) - log(f)).
    # TODO(synk): on v7x the two EUP log pushes are near-critical; a bf16 log
    # (~2x EUP rate) would halve that at ~0.3-0.5% relative loss error.
    diff = jnp.log(r) - jnp.log(f)
    sq = diff * diff                       # |x|^2 == x*x for real x

    def _reduce(x):
        # Split the per-tile reduction into 8 independent accumulator chains
        # (ILP across the VALU slots) when the tile is large enough; final
        # combine stays a lane/sublane-dense (1, 8, 128) partial.
        if groups_per_tile % 8 == 0 and groups_per_tile >= 16:
            x = jnp.sum(x.reshape(groups_per_tile // 8, 8, SUBLANES, LANES),
                        axis=0)
        return jnp.sum(x, axis=0, keepdims=True)

    if needs_mask:
        last = num_tiles - 1
        pid = pl.program_id(0)

        @pl.when(pid != last)
        def _():
            out_ref[...] = _reduce(sq)

        @pl.when(pid == last)
        def _():
            # Only the last tile reads past the end of the (groups, 8, 128)
            # prefix.  Select 0.0 for out-of-range groups BEFORE the reduce
            # (never multiply: OOB garbage can be NaN/Inf).
            gids = (last * groups_per_tile
                    + jax.lax.broadcasted_iota(jnp.int32, sq.shape, 0))
            out_ref[...] = _reduce(jnp.where(gids < groups_valid, sq, 0.0))
    else:
        out_ref[...] = _reduce(sq)


def rmse_log(fake, real):
    """RMSE_log loss (Pallas TPU). fake, real: NCHW arrays."""
    if fake.shape != real.shape:
        # Glue: bilinear resize of `fake` to real's (H, W), as in F.upsample.
        # TODO(synk): jax.image.resize 'bilinear' uses half-pixel centers; exact
        # parity with the deprecated F.upsample convention is not guaranteed.
        N, C = fake.shape[0], fake.shape[1]
        _, _, H, W = real.shape
        fake = jax.image.resize(fake, (N, C, H, W), method="bilinear")

    # Keep native floating dtype on the HBM stream; only non-float inputs cast.
    if not jnp.issubdtype(fake.dtype, jnp.floating):
        fake = fake.astype(jnp.float32)
    if not jnp.issubdtype(real.dtype, jnp.floating):
        real = real.astype(jnp.float32)

    total_n = fake.size
    groups = total_n // GROUP_ELEMS
    aligned_n = groups * GROUP_ELEMS
    tail_n = total_n - aligned_n

    fake_flat = fake.reshape(-1)
    real_flat = real.reshape(-1)

    total_sum = jnp.float32(0.0)

    if groups > 0:
        itemsize = max(fake_flat.dtype.itemsize, real_flat.dtype.itemsize)
        groups_per_tile = max(1, TARGET_BLOCK_BYTES // (GROUP_ELEMS * itemsize))
        groups_per_tile = min(groups_per_tile, groups)
        if groups > MIN_GRID_STEPS:
            # Keep >= ~8 grid steps (amortize per-step overhead without
            # starving the pipeline / a possible 2-TC split).
            groups_per_tile = min(groups_per_tile, -(-groups // MIN_GRID_STEPS))
        if groups_per_tile > 8:
            groups_per_tile -= groups_per_tile % 8   # enables split reduction
        num_tiles = -(-groups // groups_per_tile)
        needs_mask = (groups % groups_per_tile) != 0

        def _prefix3d(flat):
            # 1024-aligned prefix: contiguous prefix + reshape, no pad copy.
            if tail_n:
                flat = flat[:aligned_n]
            return flat.reshape(groups, SUBLANES, LANES)

        fake3d = _prefix3d(fake_flat)
        real3d = _prefix3d(real_flat)

        kernel = functools.partial(
            _rmse_log_kernel,
            groups_valid=groups,
            groups_per_tile=groups_per_tile,
            num_tiles=num_tiles,
            needs_mask=needs_mask,
        )

        block = (groups_per_tile, SUBLANES, LANES)
        partials = pl.pallas_call(
            kernel,
            out_shape=jax.ShapeDtypeStruct((num_tiles, SUBLANES, LANES),
                                           jnp.float32),
            grid_spec=pltpu.PrefetchScalarGridSpec(
                num_scalar_prefetch=0,
                grid=(num_tiles,),
                in_specs=[
                    pl.BlockSpec(block, lambda i: (i, 0, 0)),
                    pl.BlockSpec(block, lambda i: (i, 0, 0)),
                ],
                out_specs=pl.BlockSpec((1, SUBLANES, LANES),
                                       lambda i: (i, 0, 0)),
            ),
            compiler_params=pltpu.CompilerParams(
                # Independent tiles -> megacore-friendly.
                # TODO(synk): verify in xprof that v7x actually shards this axis
                # across its 2 TensorCores; if not, switch to CORE_PARALLEL.
                dimension_semantics=("parallel",),
                # 2 inputs x 2 buffers x ~2 MiB + in-kernel f32 temporaries;
                # fits on v5e/v6e (128 MiB) and v7x (64 MiB physical).
                vmem_limit_bytes=32 * 1024 * 1024,
            ),
        )(fake3d, real3d)

        total_sum = total_sum + jnp.sum(partials)

    if tail_n:
        # < 1024 leftover elements: folded into the tiny plain-JAX finalize
        # instead of padding (avoids an extra HBM copy of both inputs).
        ft = fake_flat[aligned_n:].astype(jnp.float32)
        rt = real_flat[aligned_n:].astype(jnp.float32)
        dt = jnp.log(rt) - jnp.log(ft)
        total_sum = total_sum + jnp.sum(dt * dt)

    # Tiny finalize: mean + sqrt.
    return jnp.sqrt(total_sum / jnp.float32(total_n))


if __name__ == "__main__":
    key = jax.random.PRNGKey(0)
    k_fake, k_real = jax.random.split(key)

    # Case 1: aligned size (2*4*16*16 = 2048 elements), positive inputs, NCHW.
    shape = (2, 4, 16, 16)
    fake = jax.random.uniform(k_fake, shape, jnp.float32, minval=0.1, maxval=2.0)
    real = jax.random.uniform(k_real, shape, jnp.float32, minval=0.1, maxval=2.0)
    loss = rmse_log(fake, real)
    jax.block_until_ready(loss)
    ref = jnp.sqrt(jnp.mean(jnp.abs(jnp.log(real) - jnp.log(fake)) ** 2))
    assert jnp.allclose(loss, ref, rtol=1e-5, atol=1e-5), (loss, ref)

    # Case 2: ragged size -> multi-tile grid, pl.when-gated last-tile mask, and
    # the plain-JAX tail path (no padding copy).
    shape2 = (1, 1, 520, 520)
    f2 = jax.random.uniform(k_fake, shape2, jnp.float32, minval=0.1, maxval=2.0)
    r2 = jax.random.uniform(k_real, shape2, jnp.float32, minval=0.1, maxval=2.0)
    loss2 = rmse_log(f2, r2)
    jax.block_until_ready(loss2)
    ref2 = jnp.sqrt(jnp.mean(jnp.abs(jnp.log(r2) - jnp.log(f2)) ** 2))
    assert jnp.allclose(loss2, ref2, rtol=1e-5, atol=1e-5), (loss2, ref2)

    # Case 3: shape-mismatch path (bilinear upsample glue) just needs to run.
    fake_small = jax.random.uniform(k_fake, (2, 4, 8, 8), jnp.float32,
                                    minval=0.1, maxval=2.0)
    loss3 = rmse_log(fake_small, real)
    jax.block_until_ready(loss3)

    print("KERNEL_OK")
</pallas_src>

<mosaic_0001>
module attributes {stable_mosaic.version = 11 : i64} {
  func.func @_rmse_log_kernel(%arg0: i32, %arg1: memref<2x8x128xf32, #tpu.memory_space<vmem>>, %arg2: memref<2x8x128xf32, #tpu.memory_space<vmem>>, %arg3: memref<1x8x128xf32, #tpu.memory_space<vmem>>) attributes {dimension_semantics = [#tpu.dimension_semantics<parallel>], iteration_bounds = array<i64: 1>, scalar_prefetch = 0 : i64, scratch_operands = 0 : i64, tpu.core_type = #tpu.core_type<tc>, window_params = [{transform_indices = @transform_0, window_bounds = array<i64: 2, 8, 128>}, {transform_indices = @transform_1, window_bounds = array<i64: 2, 8, 128>}, {transform_indices = @transform_2, window_bounds = array<i64: 1, 8, 128>}]} {
    %c0 = arith.constant 0 : index
    %c0_0 = arith.constant 0 : index
    %c0_1 = arith.constant 0 : index
    %0 = vector.load %arg1[%c0, %c0_0, %c0_1] : memref<2x8x128xf32, #tpu.memory_space<vmem>>, vector<2x8x128xf32>
    %c0_2 = arith.constant 0 : index
    %c0_3 = arith.constant 0 : index
    %c0_4 = arith.constant 0 : index
    %1 = vector.load %arg2[%c0_2, %c0_3, %c0_4] : memref<2x8x128xf32, #tpu.memory_space<vmem>>, vector<2x8x128xf32>
    %2 = math.log %1 : vector<2x8x128xf32>
    %3 = math.log %0 : vector<2x8x128xf32>
    %4 = arith.subf %2, %3 : vector<2x8x128xf32>
    %5 = arith.mulf %4, %4 : vector<2x8x128xf32>
    %cst = arith.constant dense<0.000000e+00> : vector<8x128xf32>
    %6 = vector.multi_reduction <add>, %5, %cst [0] : vector<2x8x128xf32> to vector<8x128xf32>
    %7 = vector.shape_cast %6 : vector<8x128xf32> to vector<1x8x128xf32>
    %c0_5 = arith.constant 0 : index
    %c0_6 = arith.constant 0 : index
    %c0_7 = arith.constant 0 : index
    %8 = vector.load %arg3[%c0_5, %c0_6, %c0_7] : memref<1x8x128xf32, #tpu.memory_space<vmem>>, vector<1x8x128xf32>
    tpu.vector_store %arg3[%c0_5, %c0_6, %c0_7], %7 {strides = array<i32>} : memref<1x8x128xf32, #tpu.memory_space<vmem>>, vector<1x8x128xf32>,
    return
  }
  func.func @transform_0(%arg0: i32) -> (i32, i32, i32) {
    %c0_i32 = arith.constant 0 : i32
    %c0_i32_0 = arith.constant 0 : i32
    %c0_i32_1 = arith.constant 0 : i32
    return %arg0, %c0_i32, %c0_i32_0 : i32, i32, i32
  }
  func.func @transform_1(%arg0: i32) -> (i32, i32, i32) {
    %c0_i32 = arith.constant 0 : i32
    %c0_i32_0 = arith.constant 0 : i32
    %c0_i32_1 = arith.constant 0 : i32
    return %arg0, %c0_i32, %c0_i32_0 : i32, i32, i32
  }
  func.func @transform_2(%arg0: i32) -> (i32, i32, i32) {
    %c0_i32 = arith.constant 0 : i32
    %c0_i32_0 = arith.constant 0 : i32
    %c0_i32_1 = arith.constant 0 : i32
    return %arg0, %c0_i32, %c0_i32_0 : i32, i32, i32
  }
}

</mosaic_0001>

<bundles_post_ra>
// kernel: tpu_custom_call.1
= control target key start
LH: loop header
LB: loop body
LE: loop exit
PB: predicated region body
PF: predicated region fallthrough
CT: control target
= control target key end

     0   :  { %7 = vsyncpa [#allocation3], 0  ;;  %s200_s0 = inlined_call_operand.hbm [shape: f32[2,8,128], index: 0, kind: input, shape index: {}]   ;;  %s201_s1 = inlined_call_operand.hbm [shape: f32[2,8,128], index: 1, kind: input, shape index: {}]   ;;  %s202_s2 = inlined_call_operand.hbm [shape: f32[1,8,128], index: 2, kind: output, shape index: {}]  }
   0x1   :  { %8 = vsyncpa [#allocation6], 0 }
   0x2   :  { %9 = vsyncpa [#allocation4], 0  ;;  %s14_s11 = sshll.u32 %s200_s0, 4  ;;  %s171_s12 = smov [#allocation2]   ;;  %s15_s11 = int_to_ptr.hbm [resolvable:$true] %s14_s11 }
   0x3   :  { %s16_s13 = sshll.u32 %s171_s12, 4  ;;  %s27_s16 = sshll.u32 %s201_s1, 4  ;;  %s17_s13 = int_to_ptr.vmem [resolvable:$true] %s16_s13  ;;  %s28_s16 = int_to_ptr.hbm [resolvable:$true] %s27_s16 }
   0x4   :  { %s172_s17 = smov 128   ;;  %s173_s18 = smov 8  }
   0x5   :  { %22 = dma.hbm_to_vmem [thread:$0]  %s15_s11, 256, %s17_s13, [#allocation3], %s172_s17, %s172_s17, %s173_s18  }
   0x6   :  { %s174_s19 = smov [#allocation5]  }
   0x7   :  { %s29_s20 = sshll.u32 %s174_s19, 4  ;;  %s30_s20 = int_to_ptr.vmem [resolvable:$true] %s29_s20 }
   0x8   :  { %35 = dma.hbm_to_vmem [thread:$0]  %s28_s16, 256, %s30_s20, [#allocation6], %s172_s17, %s172_s17, %s173_s18  }
   0x9   :  { %165 = dma.done.wait [#allocation3], 256  }
   0xa   :  { %166 = vsyncadd [#allocation3], 4294967040 }
   0xb   :  { %167 = dma.done.wait [#allocation6], 256  }
   0xc   :  { %168 = vsyncadd [#allocation6], 4294967040  ;;  %v44_v0 = vld [vmem:[#allocation2] sm:$0xff]  ;;  %v46_v1 = vld [vmem:[#allocation5] sm:$0xff]  ;;  %s175_s0 = smov [#allocation7]   ;;  %s69_s23 = sshll.u32 %s202_s2, 4  ;;  %s70_s23 = int_to_ptr.hbm [resolvable:$true] %s69_s23 }
   0xd   :  { %v45_v2 = vld [vmem:[#allocation2 + $0x8] sm:$0xff]  ;;  %v47_v3 = vld [vmem:[#allocation5 + $0x8] sm:$0xff]  ;;  %85 = vlog2.f32 %v46_v1  ;;  %s67_s1 = sshll.u32 %s175_s0, 4  ;;  %s68_s1 = int_to_ptr.vmem [resolvable:$true] %s67_s1 }
   0xe   :  { %87 = vlog2.f32 %v47_v3 }
   0xf   :  { %89 = vlog2.f32 %v44_v0 }
  0x10   :  { %91 = vlog2.f32 %v45_v2 }
  0x13   :  { %v86_v4 = vpop.eup %85 }
  0x14   :  { %v88_v5 = vpop.eup %87  ;;  %v49_v6 = vmul.f32 0.6931472, %v86_v4 }
  0x15   :  { %v90_v7 = vpop.eup %89  ;;  %v51_v8 = vmul.f32 0.6931472, %v88_v5 }
  0x16   :  { %v92_v9 = vpop.eup %91  ;;  %v53_v10 = vmul.f32 0.6931472, %v90_v7 }
  0x17   :  { %v55_v11 = vmul.f32 0.6931472, %v92_v9 }
  0x18   :  { %v56_v12 = vsub.f32 %v49_v6, %v53_v10 }
  0x19   :  { %v57_v13 = vsub.f32 %v51_v8, %v55_v11 }
  0x1a   :  { %v58_v14 = vmul.f32 %v56_v12, %v56_v12 }
  0x1b   :  { %v59_v15 = vmul.f32 %v57_v13, %v57_v13 }
  0x1d   :  { %v60_v16 = vadd.f32 %v59_v15, %v58_v14 }
  0x1f   :  { %61 = vst [vmem:[#allocation7] sm:$0xff] %v60_v16 }
  0x20   :  { %72 = dma.vmem_to_hbm [thread:$0]  %s68_s1, 128, %s70_s23, [#allocation4]  }
  0x21   :  { %169 = dma.done.wait [#allocation4], 128  }
  0x22   :  { %170 = vsyncadd [#allocation4], 4294967168 }
  0x23   :  { %77 = vsyncpa [#allocation3], 1 }
  0x24   :  { %78 = vsyncpa [#allocation6], 1 }
  0x25   :  { %79 = vsyncpa [#allocation4], 1 }

</bundles_post_ra>
